<compile_context>
chip_gen: v7x
topology: tpu7x:2x2x1
jax: 0.10.0
libtpu: 0.0.40
codegen_flags: <defaults>
</compile_context>

<pallas_src>
import math
import functools

import jax
import jax.numpy as jnp
from jax.experimental import pallas as pl
from jax.experimental.pallas import tpu as pltpu


# ---------------------------------------------------------------------------
# Kernels
# ---------------------------------------------------------------------------

def _compute_pe_tile(invf, phase, tile_r, batch):
    """Sinusoidal PE for the current row tile of the collapsed [S*B, D] layout.

    Row r of the collapsed layout corresponds to sequence position r // batch.
    """
    d = invf.shape[-1]
    r0 = pl.program_id(0) * tile_r
    row = jax.lax.broadcasted_iota(jnp.int32, (tile_r, d), 0) + r0
    # floor(row / batch) in f32 (exact for integer-valued f32 operands).
    pos = jnp.floor(row.astype(jnp.float32) / jnp.float32(batch))
    return jnp.sin(pos * invf + phase)      # (tile_r, D); sin -> EUP slot


def _pe_add_kernel(x_ref, invf_ref, phase_ref, o_ref, *, batch, tile_r):
    pe = _compute_pe_tile(invf_ref[...], phase_ref[...], tile_r, batch)
    val = x_ref[...].astype(jnp.float32) + pe
    o_ref[...] = val.astype(o_ref.dtype)


def _pe_add_dropout_kernel(x_ref, invf_ref, phase_ref, keep_ref, o_ref, *,
                           batch, tile_r, scale):
    pe = _compute_pe_tile(invf_ref[...], phase_ref[...], tile_r, batch)
    val = (x_ref[...].astype(jnp.float32) + pe) * (keep_ref[...] * scale)
    o_ref[...] = val.astype(o_ref.dtype)


# ---------------------------------------------------------------------------
# Wrapper
# ---------------------------------------------------------------------------

def _pick_tile_rows(total_rows: int, d: int, bytes_per_elem: int = 4,
                    target_bytes: int = 2 << 20) -> int:
    """Row-tile size: ~2 MiB per block, multiple of 8 sublanes, capped at total."""
    if total_rows * d * bytes_per_elem <= target_bytes:
        return total_rows
    tr = max(8, (target_bytes // (d * bytes_per_elem)) // 8 * 8)
    return min(int(tr), total_rows)


def positional_encoding(x, key, *, p: float = 0.1, training: bool = True,
                        tile_rows: int | None = None):
    """Forward of PositionalEncoding: x + pe[:S], then dropout(p).

    Args:
      x: [seq_len, batch, d_model] array.
      key: jax PRNG key used for the dropout mask (training mode only).
    """
    S, B, D = x.shape
    R = S * B
    x2d = x.reshape(R, D)                     # lane-dense layout

    # Per-lane sinusoid constants: inv_freq[d] = exp(-ln(1e4) * (2*(d//2))/D),
    # phase[d] = pi/2 on odd lanes (turns sin into cos), matching the PyTorch buffer.
    d_idx = jnp.arange(D)
    inv_freq = jnp.exp(((d_idx // 2) * 2).astype(jnp.float32)
                       * (-math.log(10000.0) / D)).reshape(1, D)
    phase = jnp.where(d_idx % 2 == 1,
                      jnp.float32(math.pi / 2.0),
                      jnp.float32(0.0)).reshape(1, D)

    if tile_rows is None:
        tile_rows = _pick_tile_rows(R, D)
    grid = (pl.cdiv(R, tile_rows),)

    row_spec = pl.BlockSpec((tile_rows, D), lambda i: (i, 0))
    const_spec = pl.BlockSpec((1, D), lambda i: (0, 0))

    use_dropout = training and p > 0.0
    if use_dropout:
        keep = jax.random.bernoulli(key, 1.0 - p, (R, D)).astype(jnp.float32)
        kernel = functools.partial(_pe_add_dropout_kernel, batch=B,
                                   tile_r=tile_rows, scale=1.0 / (1.0 - p))
        in_specs = [row_spec, const_spec, const_spec, row_spec]
        args = (x2d, inv_freq, phase, keep)
    else:
        kernel = functools.partial(_pe_add_kernel, batch=B, tile_r=tile_rows)
        in_specs = [row_spec, const_spec, const_spec]
        args = (x2d, inv_freq, phase)

    out2d = pl.pallas_call(
        kernel,
        out_shape=jax.ShapeDtypeStruct((R, D), x.dtype),
        grid=grid,
        in_specs=in_specs,
        out_specs=row_spec,
        compiler_params=pltpu.CompilerParams(
            dimension_semantics=("parallel",),
        ),
    )(*args)
    return out2d.reshape(S, B, D)


# ---------------------------------------------------------------------------
# Pure-JAX reference PE buffer (mirrors the PyTorch register_buffer exactly).
# ---------------------------------------------------------------------------

def _build_pe_reference(d_model: int, max_len: int = 5000) -> jnp.ndarray:
    position = jnp.arange(max_len, dtype=jnp.float32)[:, None]
    div_term = jnp.exp(jnp.arange(0, d_model, 2, dtype=jnp.float32)
                       * (-math.log(10000.0) / d_model))
    pe = jnp.zeros((max_len, 1, d_model), dtype=jnp.float32)
    pe = pe.at[:, 0, 0::2].set(jnp.sin(position * div_term))
    pe = pe.at[:, 0, 1::2].set(jnp.cos(position * div_term))
    return pe


if __name__ == "__main__":
    # Small shapes consistent with the module: x is [seq_len, batch, d_model].
    S, B, D = 8, 2, 32
    key = jax.random.PRNGKey(0)
    kx, kdrop = jax.random.split(key)
    x = jax.random.normal(kx, (S, B, D), dtype=jnp.float32)

    pe_ref = _build_pe_reference(D)[:S]          # [S, 1, D]
    y_ref = x + pe_ref                           # broadcast over batch

    # Eval-mode forward (dropout is identity).
    y_eval = positional_encoding(x, kdrop, p=0.5, training=False)
    y_eval = jax.block_until_ready(y_eval)
    assert y_eval.shape == (S, B, D)
    assert jnp.allclose(y_eval, y_ref, atol=1e-5), "eval-mode mismatch"

    # Training-mode forward (inverted dropout, p matches the module's pos_encoder p=0.5).
    p = 0.5
    y_train = positional_encoding(x, kdrop, p=p, training=True)
    y_train = jax.block_until_ready(y_train)
    assert y_train.shape == (S, B, D)
    kept_val = y_ref / (1.0 - p)
    ok = (jnp.isclose(y_train, 0.0, atol=1e-6)
          | jnp.isclose(y_train, kept_val, atol=1e-5, rtol=1e-5))
    assert bool(jnp.all(ok)), "training-mode dropout structure mismatch"

    print("KERNEL_OK")
</pallas_src>

<mosaic_0001>
module attributes {stable_mosaic.version = 11 : i64} {
  func.func @_pe_add_kernel(%arg0: i32, %arg1: memref<16x32xf32, #tpu.memory_space<vmem>>, %arg2: memref<1x32xf32, #tpu.memory_space<vmem>>, %arg3: memref<1x32xf32, #tpu.memory_space<vmem>>, %arg4: memref<16x32xf32, #tpu.memory_space<vmem>>) attributes {dimension_semantics = [#tpu.dimension_semantics<parallel>], iteration_bounds = array<i64: 1>, scalar_prefetch = 0 : i64, scratch_operands = 0 : i64, tpu.core_type = #tpu.core_type<tc>, window_params = [{transform_indices = @transform_0, window_bounds = array<i64: 16, 32>}, {pipeline_mode = #tpu.pipeline_mode<synchronous>, transform_indices = @transform_1, window_bounds = array<i64: 1, 32>}, {pipeline_mode = #tpu.pipeline_mode<synchronous>, transform_indices = @transform_2, window_bounds = array<i64: 1, 32>}, {transform_indices = @transform_3, window_bounds = array<i64: 16, 32>}]} {
    %c0 = arith.constant 0 : index
    %c0_0 = arith.constant 0 : index
    %0 = vector.load %arg2[%c0, %c0_0] : memref<1x32xf32, #tpu.memory_space<vmem>>, vector<1x32xf32>
    %c0_1 = arith.constant 0 : index
    %c0_2 = arith.constant 0 : index
    %1 = vector.load %arg3[%c0_1, %c0_2] : memref<1x32xf32, #tpu.memory_space<vmem>>, vector<1x32xf32>
    %c16_i32 = arith.constant 16 : i32
    %2 = arith.muli %arg0, %c16_i32 : i32
    %3 = tpu.iota {dimensions = array<i32: 0>} : vector<16x32xi32>
    %4 = vector.broadcast %2 : i32 to vector<16x32xi32>
    %5 = arith.addi %3, %4 : vector<16x32xi32>
    %6 = arith.sitofp %5 : vector<16x32xi32> to vector<16x32xf32>
    %cst = arith.constant 2.000000e+00 : f32
    %7 = vector.broadcast %cst : f32 to vector<16x32xf32>
    %8 = arith.divf %6, %7 : vector<16x32xf32>
    %9 = math.floor %8 : vector<16x32xf32>
    %10 = vector.broadcast %0 : vector<1x32xf32> to vector<16x32xf32>
    %11 = arith.mulf %9, %10 : vector<16x32xf32>
    %12 = vector.broadcast %1 : vector<1x32xf32> to vector<16x32xf32>
    %13 = arith.addf %11, %12 : vector<16x32xf32>
    %14 = math.sin %13 : vector<16x32xf32>
    %c0_3 = arith.constant 0 : index
    %c0_4 = arith.constant 0 : index
    %15 = vector.load %arg1[%c0_3, %c0_4] : memref<16x32xf32, #tpu.memory_space<vmem>>, vector<16x32xf32>
    %16 = arith.addf %15, %14 : vector<16x32xf32>
    %c0_5 = arith.constant 0 : index
    %c0_6 = arith.constant 0 : index
    %17 = vector.load %arg4[%c0_5, %c0_6] : memref<16x32xf32, #tpu.memory_space<vmem>>, vector<16x32xf32>
    tpu.vector_store %arg4[%c0_5, %c0_6], %16 {strides = array<i32>} : memref<16x32xf32, #tpu.memory_space<vmem>>, vector<16x32xf32>,
    return
  }
  func.func @transform_0(%arg0: i32) -> (i32, i32) {
    %c0_i32 = arith.constant 0 : i32
    %c0_i32_0 = arith.constant 0 : i32
    return %arg0, %c0_i32 : i32, i32
  }
  func.func @transform_1(%arg0: i32) -> (i32, i32) {
    %c0_i32 = arith.constant 0 : i32
    %c0_i32_0 = arith.constant 0 : i32
    %c0_i32_1 = arith.constant 0 : i32
    return %c0_i32, %c0_i32_0 : i32, i32
  }
  func.func @transform_2(%arg0: i32) -> (i32, i32) {
    %c0_i32 = arith.constant 0 : i32
    %c0_i32_0 = arith.constant 0 : i32
    %c0_i32_1 = arith.constant 0 : i32
    return %c0_i32, %c0_i32_0 : i32, i32
  }
  func.func @transform_3(%arg0: i32) -> (i32, i32) {
    %c0_i32 = arith.constant 0 : i32
    %c0_i32_0 = arith.constant 0 : i32
    return %arg0, %c0_i32 : i32, i32
  }
}

</mosaic_0001>

<bundles_post_ra>
// kernel: tpu_custom_call.1
= control target key start
LH: loop header
LB: loop body
LE: loop exit
PB: predicated region body
PF: predicated region fallthrough
CT: control target
= control target key end

     0   :  { %8 = vsyncpa [#allocation3], 0  ;;  %s521_s0 = inlined_call_operand.hbm [shape: f32[16,32], index: 0, kind: input, shape index: {}]   ;;  %s522_s1 = inlined_call_operand.vmem [shape: f32[1,32], index: 1, kind: input, shape index: {}]   ;;  %s523_s2 = inlined_call_operand.vmem [shape: f32[1,32], index: 2, kind: input, shape index: {}]   ;;  %s524_s3 = inlined_call_operand.hbm [shape: f32[16,32], index: 3, kind: output, shape index: {}]  }
   0x1   :  { %9 = vsyncpa [#allocation4], 0  ;;  %s377_s12 = smov [#allocation2]   ;;  %s329_s16 = scalar_lea.hbm %s521_s0, 256 }
   0x2   :  { %s15_s13 = sshll.u32 %s377_s12, 4  ;;  %p330_p0 = scmp.ne.s32.totalorder %s521_s0, %s329_s16  ;;  %s16_s13 = int_to_ptr.vmem [resolvable:$true] %s15_s13 }
   0x3   :  { %p333_p1 = scmp.lt.u32.totalorder %s329_s16, %s521_s0 }
   0x5   :  { %p335_p2 = pnand %p333_p1, %p330_p0 }
   0x7   :  { %338 = shalt.err (!%p335_p2)
}
   0x8   :  { %s339_s21 = scalar_lea.vmem %s16_s13, 256  ;;  %p344_p4 = scmp.lt.s32.totalorder %s16_s13, %s16_s13 }
   0x9   :  { %p340_p3 = scmp.ne.s32.totalorder %s16_s13, %s339_s21  ;;  %p345_p5 = scmp.lt.s32.totalorder %s339_s21, %s339_s21 }
   0xb   :  { %p346_p6 = por %p345_p5, %p344_p4 }
   0xd   :  { %p347_p7 = pnand %p346_p6, %p340_p3 }
   0xf   :  { %350 = shalt.err (!%p347_p7)
}
  0x10   :  { %s378_s22 = smov 128   ;;  %s379_s23 = smov 8  }
  0x11   :  { %21 = dma.hbm_to_vmem [thread:$0]  %s521_s0, 256, %s16_s13, [#allocation3], %s378_s22, %s378_s22, %s379_s23  }
  0x12   :  { %373 = dma.done.wait [#allocation3], 256  }
  0x13   :  { %374 = vsyncadd [#allocation3], 4294967040  ;;  %v32_v0 = vlaneseq  ;;  %v293_v6 = vld [vmem:[%s522_s1] ss:$0 sm:$0xff]  ;;  %v380_v34 = vmov 683565275  }
  0x14   :  { %v294_v9 = vld [vmem:[%s523_s2] ss:$0 sm:$0xff]  ;;  %v381_v36 = vmov 2475754826   ;;  %v382_v38 = vmov 2131351028  }
  0x15   :  { %v33_v1 = vshrl.u32 %v32_v0, 7  ;;  %v383_v40 = vmov 2102212464   ;;  %v384_v42 = vmov 920167782   ;;  %s386_s0 = smov [#allocation5]  }
  0x16   :  { %v385_v49 = vmov 1326507024   ;;  %s281_s1 = sshll.u32 %s386_s0, 4  ;;  %s282_s1 = int_to_ptr.vmem [resolvable:$true] %s281_s1 }
  0x17   :  { %v38_v2 = vcvt.s32.f32 %v33_v1  ;;  %v34_v3 = vadd.s32 8, %v33_v1  ;;  %s351_s2 = scalar_lea.vmem %s282_s1, 256  ;;  %p356_p9 = scmp.lt.s32.totalorder %s282_s1, %s282_s1 }
  0x18   :  { %p352_p8 = scmp.ne.s32.totalorder %s282_s1, %s351_s2  ;;  %p357_p10 = scmp.lt.s32.totalorder %s351_s2, %s351_s2 }
  0x19   :  { %v41_v4 = vmul.f32 0.5, %v38_v2  ;;  %v39_v5 = vcvt.s32.f32 %v34_v3 }
  0x1a   :  { %p358_p11 = por %p357_p10, %p356_p9 }
  0x1b   :  { %v43_v7 = vfloor.f32 %v41_v4  ;;  %v42_v8 = vmul.f32 0.5, %v39_v5 }
  0x1c   :  { %p359_p12 = pnand %p358_p11, %p352_p8 }
  0x1d   :  { %v51_v10 = vmul.f32 %v293_v6, %v43_v7  ;;  %v44_v11 = vfloor.f32 %v42_v8 }
  0x1f   :  { %v428_v12 = vadd.f32 %v294_v9, %v51_v10  ;;  %v52_v13 = vmul.f32 %v293_v6, %v44_v11 }
  0x21   :  { %v61_v14 = vand.u32 2147483647, %v428_v12  ;;  %v64_v15 = vand.u32 2139095040, %v428_v12  ;;  %v432_v16 = vadd.f32 %v294_v9, %v52_v13  ;;  %vm63_vm14 = vcmp.lt.s32.totalorder %v428_v12, 0 }
  0x23   :  { %v65_v17 = vshrl.u32 %v64_v15, 23  ;;  %v68_v18 = vand.u32 8388607, %v61_v14  ;;  %v165_v19 = vand.u32 2147483647, %v432_v16  ;;  %v168_v20 = vand.u32 2139095040, %v432_v16 }
  0x24   :  { %vm62_vm15 = vcmp.le.f32.partialorder %v61_v14, 0.7853982 }
  0x25   :  { %v295_v21 = vadd.s32 4294967169, %v65_v17  ;;  %v169_v22 = vshrl.u32 %v168_v20, 23  ;;  %v69_v24 = vor.u32 8388608, %v68_v18  ;;  %v440_v26 = vand.u32 8388607, %v165_v19 }
  0x27   :  { %v71_v23 = vadd.s32 1, %v295_v21  ;;  %v299_v25 = vadd.s32 4294967169, %v169_v22  ;;  %v442_v31 = vshll.u32 %v69_v24, 8  ;;  %v173_v32 = vor.u32 8388608, %v440_v26 }
  0x29   :  { %vm72_vm0 = vcmp.gt.s32.totalorder %v71_v23, 0  ;;  %v175_v28 = vadd.s32 1, %v299_v25 }
  0x2a   :  { %v73_v27 = vsel %vm72_vm0, %v71_v23, 0  ;;  %vm167_vm0 = vcmp.lt.s32.totalorder %v432_v16, 0 }
  0x2b   :  { %v74_v29 = vshrl.u32 %v73_v27, 5  ;;  %v75_v30 = vand.u32 31, %v73_v27  ;;  %vm176_vm1 = vcmp.gt.s32.totalorder %v175_v28, 0 }
  0x2c   :  { %v177_v54 = vsel %vm176_vm1, %v175_v28, 0  ;;  %vm493_vm1 = vcmp.le.f32.partialorder %v165_v19, 0.7853982 }
  0x2d   :  { %v76_v33 = vsub.s32 32, %v75_v30  ;;  %v78_v35 = vshll.u32 %v380_v34, %v75_v30  ;;  %v81_v37 = vshll.u32 %v381_v36, %v75_v30  ;;  %v84_v39 = vshll.u32 %v382_v38, %v75_v30 }
  0x2e   :  { %v87_v41 = vshll.u32 %v383_v40, %v75_v30  ;;  %v90_v43 = vshll.u32 %v384_v42, %v75_v30  ;;  %vm93_vm2 = vcmp.lt.s32.totalorder %v74_v29, 1  ;;  %vm94_vm3 = vcmp.lt.s32.totalorder %v74_v29, 2 }
  0x2f   :  { %v77_v44 = vshrl.u32 %v380_v34, %v76_v33  ;;  %v79_v45 = vshrl.u32 %v381_v36, %v76_v33  ;;  %v82_v46 = vshrl.u32 %v382_v38, %v76_v33  ;;  %v85_v47 = vshrl.u32 %v383_v40, %v76_v33 }
  0x30   :  { %v88_v48 = vshrl.u32 %v384_v42, %v76_v33  ;;  %v91_v50 = vshrl.u32 %v385_v49, %v76_v33  ;;  %vm95_vm4 = vcmp.lt.s32.totalorder %v74_v29, 3  ;;  %vm96_vm5 = vcmp.lt.s32.totalorder %v74_v29, 4 }
  0x31   :  { %v80_v51 = vor.u32 %v79_v45, %v78_v35  ;;  %v83_v52 = vor.u32 %v82_v46, %v81_v37  ;;  %v86_v53 = vor.u32 %v85_v47, %v84_v39  ;;  %v178_v57 = vshrl.u32 %v177_v54, 5 }
  0x32   :  { %v89_v55 = vor.u32 %v88_v48, %v87_v41  ;;  %v92_v56 = vor.u32 %v91_v50, %v90_v43  ;;  %v179_v58 = vand.u32 31, %v177_v54 }
  0x33   :  { %v97_v59 = vsel %vm93_vm2, %v77_v44, %v80_v51  ;;  %v98_v60 = vsel %vm96_vm5, %v86_v53, 2102212464  ;;  %v101_v61 = vsel %vm93_vm2, %v80_v51, %v83_v52  ;;  %v105_v62 = vsel %vm93_vm2, %v83_v52, %v86_v53 }
  0x34   :  { %v99_v63 = vsel %vm95_vm4, %v83_v52, %v98_v60  ;;  %v102_v0 = vsel %vm96_vm5, %v89_v55, 920167782  ;;  %v106_v1 = vsel %vm96_vm5, %v92_v56, 1326507024  ;;  %v180_v2 = vsub.s32 32, %v179_v58 }
  0x35   :  { %v100_v3 = vsel %vm94_vm3, %v97_v59, %v99_v63  ;;  %v103_v4 = vsel %vm95_vm4, %v86_v53, %v102_v0  ;;  %v107_v5 = vsel %vm95_vm4, %v89_v55, %v106_v1  ;;  %v182_v6 = vshll.u32 %v380_v34, %v179_v58 }
  0x36   :  { %v104_v7 = vsel %vm94_vm3, %v101_v61, %v103_v4  ;;  %v108_v8 = vsel %vm94_vm3, %v105_v62, %v107_v5  ;;  %v116_v9 = vmul.u32 %v442_v31, %v100_v3  ;;  %v181_v10 = vshrl.u32 %v380_v34, %v180_v2 }
  0x37   :  { %v457_v11 = vmul.u32.u64.low %v442_v31, %v108_v8  ;;  %v458_v13 = vmul.u32.u64.high %v442_v31, %v108_v8, %v457_v11  ;;  %v461_v15 = vmul.u32.u64.low %v442_v31, %v104_v7  ;;  %v462_v17 = vmul.u32.u64.high %v442_v31, %v104_v7, %v461_v15 }
  0x38   :  { %v183_v18 = vshrl.u32 %v381_v36, %v180_v2  ;;  %v185_v20 = vshll.u32 %v381_v36, %v179_v58  ;;  %v186_v21 = vshrl.u32 %v382_v38, %v180_v2  ;;  %v188_v22 = vshll.u32 %v382_v38, %v179_v58 }
  0x39   :  { %v189_v23 = vshrl.u32 %v383_v40, %v180_v2  ;;  %v191_v24 = vshll.u32 %v383_v40, %v179_v58  ;;  %v192_v25 = vshrl.u32 %v384_v42, %v180_v2  ;;  %v194_v27 = vshll.u32 %v384_v42, %v179_v58 }
  0x3a   :  { %v184_v28 = vor.u32 %v183_v18, %v182_v6  ;;  %v187_v29 = vor.u32 %v186_v21, %v185_v20  ;;  %v195_v30 = vshrl.u32 %v385_v49, %v180_v2  ;;  %vm197_vm6 = vcmp.lt.s32.totalorder %v178_v57, 1 }
  0x3b   :  { %vm118_vm7 = vc.u32 %v458_v13, %v461_v15  ;;  %v119_v33 = vadd.s32 1, %v462_v17  ;;  %v190_v34 = vor.u32 %v189_v23, %v188_v22  ;;  %v213_v31 = vshll.u32 %v173_v32, 8 }
  0x3c   :  { %v193_v35 = vor.u32 %v192_v25, %v191_v24  ;;  %v196_v36 = vor.u32 %v195_v30, %v194_v27  ;;  %vm198_vm8 = vcmp.lt.s32.totalorder %v178_v57, 2  ;;  %vm199_vm9 = vcmp.lt.s32.totalorder %v178_v57, 3 }
  0x3d   :  { %v120_v37 = vsel %vm118_vm7, %v119_v33, %v462_v17  ;;  %vm200_vm10 = vcmp.lt.s32.totalorder %v178_v57, 4  ;;  %v201_v38 = vsel %vm197_vm6, %v181_v10, %v184_v28  ;;  %v205_v39 = vsel %vm197_vm6, %v184_v28, %v187_v29 }
  0x3e   :  { %v121_v40 = vadd.s32 %v120_v37, %v116_v9  ;;  %v202_v41 = vsel %vm200_vm10, %v190_v34, 2102212464  ;;  %v206_v42 = vsel %vm200_vm10, %v193_v35, 920167782  ;;  %v209_v43 = vsel %vm197_vm6, %v187_v29, %v190_v34 }
  0x3f   :  { %v203_v44 = vsel %vm199_vm9, %v187_v29, %v202_v41  ;;  %v207_v45 = vsel %vm199_vm9, %v190_v34, %v206_v42  ;;  %v210_v26 = vsel %vm200_vm10, %v196_v36, 1326507024  ;;  %v117_v4 = vadd.s32 %v461_v15, %v458_v13 }
  0x40   :  { %v122_v32 = vadd.s32 536870912, %v121_v40  ;;  %v208_v46 = vsel %vm198_vm8, %v205_v39, %v207_v45  ;;  %v211_v47 = vsel %vm199_vm9, %v193_v35, %v210_v26  ;;  %v204_v48 = vsel %vm198_vm8, %v201_v38, %v203_v44 }
  0x41   :  { %v212_v49 = vsel %vm198_vm8, %v209_v43, %v211_v47  ;;  %v475_v50 = vmul.u32.u64.low %v213_v31, %v208_v46  ;;  %v476_v51 = vmul.u32.u64.high %v213_v31, %v208_v46, %v475_v50  ;;  %v220_v56 = vmul.u32 %v213_v31, %v204_v48 }
  0x42   :  { %v123_v52 = vshrl.u32 %v122_v32, 30  ;;  %v478_v53 = vmul.u32.u64.low %v213_v31, %v212_v49  ;;  %v479_v54 = vmul.u32.u64.high %v213_v31, %v212_v49, %v478_v53  ;;  %vm153_vm5 = vweird.f32 %v428_v12 }
  0x43   :  { %v223_v58 = vadd.s32 1, %v476_v51  ;;  %vm273_vm6 = vcmask 261120   ;;  %vm257_vm10 = vweird.f32 %v432_v16 }
  0x44   :  { %v124_v55 = vshll.u32 %v123_v52, 30  ;;  %vm222_vm11 = vc.u32 %v479_v54, %v475_v50  ;;  %v147_v28 = vsub.s32 4, %v123_v52  ;;  %v221_v13 = vadd.s32 %v475_v50, %v479_v54 }
  0x45   :  { %v224_v60 = vsel %vm222_vm11, %v223_v58, %v476_v51 }
  0x46   :  { %v125_v59 = vsub.s32 %v121_v40, %v124_v55  ;;  %v225_v62 = vadd.s32 %v224_v60, %v220_v56  ;;  %v148_v35 = vsel %vm63_vm14, %v147_v28, %v123_v52  ;;  %v269_v60 = vld [vmem:[#allocation2] sm:$0xff] }
  0x47   :  { %v150_v40 = vsel %vm62_vm15, 0, %v148_v35 }
  0x48   :  { %v127_v61 = vsub.s32 0, %v125_v59  ;;  %v226_v63 = vadd.s32 536870912, %v225_v62  ;;  %v154_v45 = vadd.s32 3, %v150_v40 }
  0x4a   :  { %v296_v57 = vmin.u32 %v127_v61, %v125_v59  ;;  %v227_v1 = vshrl.u32 %v226_v63, 30  ;;  %v155_v47 = vand.u32 3, %v154_v45 }
  0x4c   :  { %v129_v0 = vclz %v296_v57  ;;  %v228_v3 = vshll.u32 %v227_v1, 30  ;;  %v251_v32 = vsub.s32 4, %v227_v1  ;;  %vm160_vm2 = vcmp.eq.s32.totalorder %v155_v47, 2 }
  0x4d   :  { %vm157_vm3 = vcmp.eq.s32.totalorder %v155_v47, 0  ;;  %vm156_vm4 = vcmp.lt.s32.totalorder %v155_v47, 2 }
  0x4e   :  { %v297_v2 = vadd.s32 4294967294, %v129_v0  ;;  %v229_v6 = vsub.s32 %v225_v62, %v228_v3  ;;  %v252_v49 = vsel %vm167_vm0, %v251_v32, %v227_v1 }
  0x4f   :  { %v254_v53 = vsel %vm493_vm1, 0, %v252_v49 }
  0x50   :  { %vm298_vm12 = vcmp.lt.s32.totalorder %v297_v2, 0  ;;  %v231_v10 = vsub.s32 0, %v229_v6  ;;  %v258_v58 = vadd.s32 3, %v254_v53 }
  0x51   :  { %v132_v5 = vsel %vm298_vm12, 0, %v297_v2 }
  0x52   :  { %v133_v7 = vsub.s32 32, %v132_v5  ;;  %v134_v8 = vshll.u32 %v125_v59, %v132_v5  ;;  %v137_v9 = vsub.s32 4294967266, %v132_v5  ;;  %v300_v18 = vmin.u32 %v231_v10, %v229_v6  ;;  %v270_v5 = vld [vmem:[#allocation2 + $0x8] sm:$0xff] }
  0x53   :  { %v259_v63 = vand.u32 3, %v258_v58 }
  0x54   :  { %v135_v11 = vshrl.u32 %v117_v4, %v133_v7  ;;  %v138_v17 = vadd.s32 127, %v137_v9  ;;  %v233_v22 = vclz %v300_v18 }
  0x55   :  { %vm264_vm7 = vcmp.eq.s32.totalorder %v259_v63, 2  ;;  %vm261_vm8 = vcmp.eq.s32.totalorder %v259_v63, 0  ;;  %vm260_vm9 = vcmp.lt.s32.totalorder %v259_v63, 2 }
  0x56   :  { %v136_v20 = vor.u32 %v135_v11, %v134_v8  ;;  %v139_v21 = vshll.u32 %v138_v17, 23  ;;  %v301_v25 = vadd.s32 4294967294, %v233_v22 }
  0x58   :  { %v140_v23 = vor.u32 4788187, %v139_v21  ;;  %v143_v24 = vcvt.s32.f32 %v136_v20  ;;  %vm302_vm13 = vcmp.lt.s32.totalorder %v301_v25, 0 }
  0x59   :  { %v236_v29 = vsel %vm302_vm13, 0, %v301_v25 }
  0x5a   :  { %v141_v27 = vand.u32 2147483647, %v140_v23  ;;  %v237_v30 = vsub.s32 32, %v236_v29  ;;  %v238_v33 = vshll.u32 %v229_v6, %v236_v29  ;;  %v241_v34 = vsub.s32 4294967266, %v236_v29 }
  0x5c   :  { %v144_v15 = vmul.f32 %v143_v24, %v141_v27  ;;  %v239_v36 = vshrl.u32 %v221_v13, %v237_v30  ;;  %v242_v37 = vadd.s32 127, %v241_v34 }
  0x5e   :  { %v145_v31 = vxor.u32 2147483648, %v144_v15  ;;  %v240_v41 = vor.u32 %v239_v36, %v238_v33  ;;  %v243_v42 = vshll.u32 %v242_v37, 23 }
  0x60   :  { %v146_v38 = vsel %vm63_vm14, %v145_v31, %v144_v15  ;;  %v244_v43 = vor.u32 4788187, %v243_v42  ;;  %v247_v44 = vcvt.s32.f32 %v240_v41 }
  0x61   :  { %v149_v39 = vsel %vm62_vm15, %v428_v12, %v146_v38 }
  0x62   :  { %321 = vcosq.f32 %v149_v39  ;;  %v245_v26 = vand.u32 2147483647, %v244_v43 }
  0x63   :  { %323 = vsinq.f32 %v149_v39 }
  0x64   :  { %v248_v46 = vmul.f32 %v247_v44, %v245_v26 }
  0x66   :  { %v249_v48 = vxor.u32 2147483648, %v248_v46 }
  0x68   :  { %v250_v50 = vsel %vm167_vm0, %v249_v48, %v248_v46 }
  0x69   :  { %v253_v52 = vsel %vm493_vm1, %v432_v16, %v250_v50 }
  0x6a   :  { %325 = vcosq.f32 %v253_v52 }
  0x6b   :  { %327 = vsinq.f32 %v253_v52 }
  0x6c   :  { %v322_v51 = vpop.eup %321 }
  0x6d   :  { %v324_v54 = vpop.eup %323  ;;  %v161_v55 = vxor.u32 2147483648, %v322_v51 }
  0x6e   :  { %v158_v19 = vxor.u32 2147483648, %v324_v54 }
  0x6f   :  { %v162_v56 = vsel %vm160_vm2, %v161_v55, %v324_v54 }
  0x70   :  { %v159_v59 = vsel %vm157_vm3, %v322_v51, %v158_v19 }
  0x71   :  { %v163_v61 = vsel %vm156_vm4, %v159_v59, %v162_v56 }
  0x72   :  { %v164_v62 = vsel %vm153_vm5, nan, %v163_v61 }
  0x73   :  { %v271_v57 = vadd.f32 %v269_v60, %v164_v62 }
  0x74   :  { %v326_v0 = vpop.eup %325 }
  0x75   :  { %274 = vst.msk [vmem:[#allocation5] sm:$0xff] %vm273_vm6, %v271_v57  ;;  %v328_v1 = vpop.eup %327  ;;  %v265_v2 = vxor.u32 2147483648, %v326_v0 }
  0x76   :  { %v262_v3 = vxor.u32 2147483648, %v328_v1 }
  0x77   :  { %v266_v12 = vsel %vm264_vm7, %v265_v2, %v328_v1 }
  0x78   :  { %v263_v4 = vsel %vm261_vm8, %v326_v0, %v262_v3 }
  0x79   :  { %v267_v6 = vsel %vm260_vm9, %v263_v4, %v266_v12 }
  0x7a   :  { %v268_v7 = vsel %vm257_vm10, nan, %v267_v6 }
  0x7b   :  { %v272_v8 = vadd.f32 %v270_v5, %v268_v7 }
  0x7d   :  { %275 = vst.msk [vmem:[#allocation5 + $0x8] sm:$0xff] %vm273_vm6, %v272_v8 }
  0x7e   :  { %362 = shalt.err (!%p359_p12)
}
  0x7f   :  { %s363_s5 = scalar_lea.hbm %s524_s3, 256 }
  0x80   :  { %p364_p13 = scmp.ne.s32.totalorder %s524_s3, %s363_s5  ;;  %p367_p0 = scmp.lt.u32.totalorder %s363_s5, %s524_s3 }
  0x82   :  { %p369_p1 = pnand %p367_p0, %p364_p13 }
  0x84   :  { %372 = shalt.err (!%p369_p1)
}
  0x85   :  { %287 = dma.vmem_to_hbm [thread:$0]  %s282_s1, 256, %s524_s3, [#allocation4], %s378_s22, %s378_s22, %s379_s23  }
  0x86   :  { %375 = dma.done.wait [#allocation4], 256  }
  0x87   :  { %376 = vsyncadd [#allocation4], 4294967040 }
  0x88   :  { %291 = vsyncpa [#allocation3], 1 }
  0x89   :  { %292 = vsyncpa [#allocation4], 1 }

</bundles_post_ra>
